<compile_context>
chip_gen: v5e
topology: v5e:2x2
jax: 0.10.0
libtpu: 0.0.40
codegen_flags: <defaults>
</compile_context>

<pallas_src>
import numpy as np
import jax
import jax.numpy as jnp
from jax.experimental import pallas as pl
from jax.experimental.pallas import tpu as pltpu


# ----------------------------------------------------------------------------
# preprocess: out[n,c,:H,:W] = x[n,c] * (1/std[c]) + (-mean[c]/std[c])
#             out pad rows/cols = 0   (pad fused into the kernel)
# Grid (N, C, S//TH); each step writes one (TH, S) row-slab of the output.
# ----------------------------------------------------------------------------
def _choose_row_tile(S):
    for th in (256, 128, 64, 32, 16, 8):
        if S % th == 0:
            return th
    return S


def _make_preprocess_kernel(H, W, S, TH, out_dtype):
    def kernel(x_ref, scale_ref, bias_ref, o_ref):
        c = pl.program_id(1)
        r = pl.program_id(2)
        scale = scale_ref[c]                       # scalar reads from SMEM
        bias = bias_ref[c]
        row0 = r * TH

        def compute_valid():
            x = x_ref[0, 0].astype(jnp.float32)    # (TH, W) — cast in-kernel
            vals = x * scale + bias                # single FMA, no vector divide
            if H % TH != 0:
                # only the straddling tile actually needs this mask; cheap VPU work
                rows = jax.lax.broadcasted_iota(jnp.int32, (TH, W), 0) + row0
                vals = jnp.where(rows < H, vals, 0.0)
            return vals.astype(out_dtype)

        if W == S:
            # fully lane-dense stores, no redundant zero fill of valid rows
            @pl.when(row0 < H)
            def _():
                o_ref[0, 0] = compute_valid()

            @pl.when(row0 >= H)
            def _():
                o_ref[0, 0] = jnp.zeros((TH, S), out_dtype)
        else:
            # one unmasked full-tile zero store, then overwrite the valid columns
            o_ref[0, 0] = jnp.zeros((TH, S), out_dtype)

            @pl.when(row0 < H)
            def _():
                o_ref[0, 0, :, :W] = compute_valid()

    return kernel


def preprocess(x, pixel_mean, pixel_std, img_size, out_dtype=jnp.float32):
    """Normalize pixel values and pad to a square input (fused Pallas kernel)."""
    N, C, H, W = x.shape
    S = int(img_size)
    TH = _choose_row_tile(S)
    n_row = S // TH

    inv_std = 1.0 / pixel_std.astype(jnp.float32)          # tiny (C,) precompute
    bias = -pixel_mean.astype(jnp.float32) * inv_std

    n_in_row_blocks = max(1, pl.cdiv(H, TH))
    in_row_map = lambda n, c, r: (n, c, jnp.minimum(r, n_in_row_blocks - 1), 0)

    cost = pl.CostEstimate(
        flops=int(2 * N * C * H * W),
        transcendentals=0,
        bytes_accessed=int(N * C * (H * W * x.dtype.itemsize
                                    + S * S * jnp.dtype(out_dtype).itemsize)),
    )

    return pl.pallas_call(
        _make_preprocess_kernel(H, W, S, TH, out_dtype),
        out_shape=jax.ShapeDtypeStruct((N, C, S, S), out_dtype),
        grid=(N, C, n_row),
        in_specs=[
            pl.BlockSpec((1, 1, TH, W), in_row_map),
            pl.BlockSpec(memory_space=pltpu.MemorySpace.SMEM),   # scale (C,)
            pl.BlockSpec(memory_space=pltpu.MemorySpace.SMEM),   # bias  (C,)
        ],
        out_specs=pl.BlockSpec((1, 1, TH, S), lambda n, c, r: (n, c, r, 0)),
        compiler_params=pltpu.CompilerParams(
            dimension_semantics=("parallel", "parallel", "parallel")),
        cost_estimate=cost,
    )(x, inv_std, bias)


# ----------------------------------------------------------------------------
# Fused loss kernel. Grid (B, n_t) over (batch, HW-tiles). Per step, block
# (1, C, T) of pred/gt is read once (bf16 / uint8 on the HBM side) and the
# kernel emits:
#   bce_ref (1,1,1,128):  lane0 = sum(gt), lane1 = sum(gt*softplus(-x)),
#                         lane2 = sum((1-gt)*softplus(x)), rest 0
#   iou_ref (1,1,C,128):  lane0 = inter_c, lane1 = union_c, rest 0  (iou mode)
# The global scalar combine is a handful of XLA ops on tiny arrays.
# ----------------------------------------------------------------------------
def _choose_hw_tile(hw, target=131072):
    if hw <= target:
        return hw
    t = (target // 128) * 128
    while t >= 128:
        if hw % t == 0:
            return t
        t -= 128
    return hw


def _make_loss_kernel(with_iou):
    def kernel(pred_ref, gt_ref, bce_ref, *iou_refs):
        x = pred_ref[...].astype(jnp.float32)        # (1, C, T) — f32 accumulation
        y = gt_ref[...].astype(jnp.float32)

        # numerically-stable softplus; only 2 transcendentals per element
        e = jnp.exp(-jnp.abs(x))                     # exp(-|x|)           (EUP)
        log1pe = jnp.log1p(e)                        # log(1+exp(-|x|))    (EUP)
        sp_neg = jnp.maximum(-x, 0.0) + log1pe       # softplus(-x) = -log sigmoid(x)
        sp_pos = sp_neg + x                          # softplus(x) via identity

        s_y = jnp.sum(y)
        s_a = jnp.sum(y * sp_neg)
        s_b = jnp.sum((1.0 - y) * sp_pos)

        lane = jax.lax.broadcasted_iota(jnp.int32, bce_ref.shape, 3)
        bce_ref[...] = jnp.where(
            lane == 0, s_y,
            jnp.where(lane == 1, s_a, jnp.where(lane == 2, s_b, 0.0)))

        if with_iou:
            iou_ref = iou_refs[0]
            # sigmoid reuses e = exp(-|x|): sigmoid(x) = where(x>=0, 1, e) / (1+e)
            p = jnp.where(x >= 0.0, 1.0, e) / (1.0 + e)
            inter = jnp.sum(p * y, axis=-1, keepdims=True)[:, None]       # (1,1,C,1)
            union = jnp.sum(p + y, axis=-1, keepdims=True)[:, None] - inter
            lane_i = jax.lax.broadcasted_iota(jnp.int32, iou_ref.shape, 3)
            iou_ref[...] = jnp.where(lane_i == 0, inter,
                                     jnp.where(lane_i == 1, union, 0.0))

    return kernel


def _fused_loss_parts(pred, gt, with_iou=True, hw_tile=None):
    """pred: (B,C,H,W) logits (bf16/f32...), gt: (B,C,H,W) mask (uint8/f32...)."""
    B, C, H, W = pred.shape
    HW = H * W
    T = hw_tile if hw_tile is not None else _choose_hw_tile(HW)
    assert HW % T == 0
    n_t = HW // T

    pred2 = pred.reshape(B, C, HW)                   # metadata-only, lane-dense
    gt2 = gt.reshape(B, C, HW)

    out_shape = [jax.ShapeDtypeStruct((B, n_t, 1, 128), jnp.float32)]
    out_specs = [pl.BlockSpec((1, 1, 1, 128), lambda b, t: (b, t, 0, 0))]
    if with_iou:
        out_shape.append(jax.ShapeDtypeStruct((B, n_t, C, 128), jnp.float32))
        out_specs.append(pl.BlockSpec((1, 1, C, 128), lambda b, t: (b, t, 0, 0)))

    bytes_out = sum(int(np.prod(s.shape)) * 4 for s in out_shape)
    cost = pl.CostEstimate(
        flops=int((20 if with_iou else 12) * B * C * HW),
        transcendentals=int(2 * B * C * HW),
        bytes_accessed=int(B * C * HW * (pred2.dtype.itemsize + gt2.dtype.itemsize)
                           + bytes_out),
    )

    outs = pl.pallas_call(
        _make_loss_kernel(with_iou),
        out_shape=tuple(out_shape),
        grid=(B, n_t),
        in_specs=[pl.BlockSpec((1, C, T), lambda b, t: (b, 0, t)),
                  pl.BlockSpec((1, C, T), lambda b, t: (b, 0, t))],
        out_specs=tuple(out_specs),
        compiler_params=pltpu.CompilerParams(
            dimension_semantics=("parallel", "parallel")),
        cost_estimate=cost,
    )(pred2, gt2)

    bce_p = outs[0]
    iou_p = outs[1] if with_iou else None
    return bce_p, iou_p, float(B * C * HW)


def _bbce_from_parts(bce_p, n):
    s_y = jnp.sum(bce_p[..., 0, 0])                  # sum(gt)
    a = jnp.sum(bce_p[..., 0, 1])                    # sum(gt * softplus(-x))
    b = jnp.sum(bce_p[..., 0, 2])                    # sum((1-gt) * softplus(x))
    eps = 1e-10
    count_pos = s_y + eps
    count_neg = n - s_y                              # == sum(1 - gt)
    ratio = count_neg / count_pos
    w_neg = count_pos / (count_pos + count_neg)
    return w_neg * (ratio * a + b) / n


def _bce_from_parts(bce_p, n):
    return (jnp.sum(bce_p[..., 0, 1]) + jnp.sum(bce_p[..., 0, 2])) / n


def _iou_from_parts(iou_p):
    inter = jnp.sum(iou_p[..., 0], axis=1)           # (B, C)
    union = jnp.sum(iou_p[..., 1], axis=1)           # (B, C)
    # NOTE: matches the original module (no eps) — an all-empty mask would NaN
    # there too.
    return jnp.mean(1.0 - inter / union)


def bbce_with_logit_loss(pred, gt):
    bce_p, _, n = _fused_loss_parts(pred, gt, with_iou=False)
    return _bbce_from_parts(bce_p, n)


def bce_with_logit_loss(pred, gt):
    bce_p, _, n = _fused_loss_parts(pred, gt, with_iou=False)
    return _bce_from_parts(bce_p, n)


def iou_loss(pred, gt):
    _, iou_p, _ = _fused_loss_parts(pred, gt, with_iou=True)
    return _iou_from_parts(iou_p)


def task_sam_generator_loss(mask_logits, gt, loss_mode="iou"):
    """Equivalent of Task_SAM.backward_G's loss_G value (forward value only).

    loss_mode: 'bce'  -> BCEWithLogitsLoss
               'bbce' -> BBCEWithLogitLoss
               'iou'  -> BCEWithLogitsLoss + _iou_loss
    Single fused kernel pass over (pred, gt) regardless of mode; the IoU branch
    is skipped statically in non-'iou' modes.
    """
    with_iou = (loss_mode == "iou")
    bce_p, iou_p, n = _fused_loss_parts(mask_logits, gt, with_iou=with_iou)
    if loss_mode == "bbce":
        loss = _bbce_from_parts(bce_p, n)
    else:
        loss = _bce_from_parts(bce_p, n)
    if with_iou:
        loss = loss + _iou_from_parts(iou_p)
    return loss


# ----------------------------------------------------------------------------
# pure-JAX references (sanity check)
# ----------------------------------------------------------------------------
def _bce_ref(pred, gt):
    loss = -(gt * jax.nn.log_sigmoid(pred) + (1.0 - gt) * jax.nn.log_sigmoid(-pred))
    return jnp.mean(loss)


def _bbce_ref(pred, gt):
    eps = 1e-10
    count_pos = jnp.sum(gt) + eps
    count_neg = jnp.sum(1.0 - gt)
    ratio = count_neg / count_pos
    w_neg = count_pos / (count_pos + count_neg)
    loss = -(ratio * gt * jax.nn.log_sigmoid(pred)
             + (1.0 - gt) * jax.nn.log_sigmoid(-pred))
    return w_neg * jnp.mean(loss)


def _iou_ref(pred, gt):
    p = jax.nn.sigmoid(pred)
    inter = jnp.sum(p * gt, axis=(2, 3))
    union = jnp.sum(p + gt, axis=(2, 3)) - inter
    return jnp.mean(1.0 - inter / union)


if __name__ == "__main__":
    key = jax.random.PRNGKey(0)
    k1, k2, k3 = jax.random.split(key, 3)

    # small shapes consistent with the module
    B, Cimg, H, W = 2, 3, 16, 16
    img_size = 32  # image_encoder.img_size (pad target)

    images = jax.random.uniform(k1, (B, Cimg, H, W), jnp.float32, 0.0, 255.0)
    pixel_mean = jnp.array([123.675, 116.28, 103.53], jnp.float32)
    pixel_std = jnp.array([58.395, 57.12, 57.375], jnp.float32)

    x_pre = jax.block_until_ready(preprocess(images, pixel_mean, pixel_std, img_size))

    # mask logits / ground truth (B, 1, H, W): narrow HBM dtypes (bf16 / uint8);
    # the kernel accumulates in f32.
    pred_bf16 = jax.random.normal(k2, (B, 1, H, W), jnp.float32).astype(jnp.bfloat16)
    gt_u8 = (jax.random.uniform(k3, (B, 1, H, W)) > 0.5).astype(jnp.uint8)

    bbce = jax.block_until_ready(bbce_with_logit_loss(pred_bf16, gt_u8))
    bce = jax.block_until_ready(bce_with_logit_loss(pred_bf16, gt_u8))
    iou = jax.block_until_ready(iou_loss(pred_bf16, gt_u8))
    total_iou = jax.block_until_ready(
        task_sam_generator_loss(pred_bf16, gt_u8, loss_mode="iou"))
    total_bbce = jax.block_until_ready(
        task_sam_generator_loss(pred_bf16, gt_u8, loss_mode="bbce"))

    # correctness vs pure-JAX references (same quantized inputs, f32 math)
    pred_f32 = pred_bf16.astype(jnp.float32)
    gt_f32 = gt_u8.astype(jnp.float32)

    ref_pre = (images - pixel_mean[None, :, None, None]) / pixel_std[None, :, None, None]
    ref_pre = jnp.pad(ref_pre, ((0, 0), (0, 0), (0, img_size - H), (0, img_size - W)))
    np.testing.assert_allclose(np.asarray(x_pre), np.asarray(ref_pre), rtol=1e-5, atol=1e-5)
    np.testing.assert_allclose(np.asarray(bbce), np.asarray(_bbce_ref(pred_f32, gt_f32)),
                               rtol=1e-4, atol=1e-5)
    np.testing.assert_allclose(np.asarray(bce), np.asarray(_bce_ref(pred_f32, gt_f32)),
                               rtol=1e-4, atol=1e-5)
    np.testing.assert_allclose(np.asarray(iou), np.asarray(_iou_ref(pred_f32, gt_f32)),
                               rtol=1e-4, atol=1e-5)
    np.testing.assert_allclose(
        np.asarray(total_iou),
        np.asarray(_bce_ref(pred_f32, gt_f32) + _iou_ref(pred_f32, gt_f32)),
        rtol=1e-4, atol=1e-5)
    np.testing.assert_allclose(np.asarray(total_bbce),
                               np.asarray(_bbce_ref(pred_f32, gt_f32)),
                               rtol=1e-4, atol=1e-5)

    print("KERNEL_OK")
</pallas_src>

<mosaic_0001>
module attributes {stable_mosaic.version = 11 : i64} {
  func.func @kernel(%arg0: i32, %arg1: i32, %arg2: i32, %arg3: memref<1x1x32x16xf32, #tpu.memory_space<vmem>>, %arg4: memref<3xf32, #tpu.memory_space<smem>>, %arg5: memref<3xf32, #tpu.memory_space<smem>>, %arg6: memref<1x1x32x32xf32, #tpu.memory_space<vmem>>) attributes {dimension_semantics = [#tpu.dimension_semantics<parallel>, #tpu.dimension_semantics<parallel>, #tpu.dimension_semantics<parallel>], iteration_bounds = array<i64: 2, 3, 1>, scalar_prefetch = 0 : i64, scratch_operands = 0 : i64, tpu.core_type = #tpu.core_type<tc>, window_params = [{transform_indices = @transform_0, window_bounds = array<i64: 1, 1, 32, 16>}, {transform_indices = @transform_1, window_bounds = array<i64: 3>}, {transform_indices = @transform_2, window_bounds = array<i64: 3>}, {transform_indices = @transform_3, window_bounds = array<i64: 1, 1, 32, 32>}]} {
    %0 = arith.index_cast %arg1 : i32 to index
    %1 = memref.load %arg4[%0] : memref<3xf32, #tpu.memory_space<smem>>
    %2 = arith.index_cast %arg1 : i32 to index
    %3 = memref.load %arg5[%2] : memref<3xf32, #tpu.memory_space<smem>>
    %c32_i32 = arith.constant 32 : i32
    %4 = arith.muli %arg2, %c32_i32 : i32
    %cst = arith.constant 0.000000e+00 : f32
    %5 = vector.broadcast %cst : f32 to vector<32x32xf32>
    %c0 = arith.constant 0 : index
    %c0_0 = arith.constant 0 : index
    %c0_1 = arith.constant 0 : index
    %c0_2 = arith.constant 0 : index
    %6 = vector.load %arg6[%c0, %c0_0, %c0_1, %c0_2] : memref<1x1x32x32xf32, #tpu.memory_space<vmem>>, vector<1x1x32x32xf32>
    %7 = vector.shape_cast %6 : vector<1x1x32x32xf32> to vector<32x32xf32>
    %8 = vector.shape_cast %5 : vector<32x32xf32> to vector<1x1x32x32xf32>
    tpu.vector_store %arg6[%c0, %c0_0, %c0_1, %c0_2], %8 {strides = array<i32>} : memref<1x1x32x32xf32, #tpu.memory_space<vmem>>, vector<1x1x32x32xf32>,
    %c16_i32 = arith.constant 16 : i32
    %9 = arith.cmpi slt, %4, %c16_i32 : i32
    %10 = arith.extui %9 : i1 to i32
    %c0_i32 = arith.constant 0 : i32
    %11 = arith.cmpi ne, %10, %c0_i32 : i32
    scf.if %11 {
      %c0_3 = arith.constant 0 : index
      %c0_4 = arith.constant 0 : index
      %c0_5 = arith.constant 0 : index
      %c0_6 = arith.constant 0 : index
      %12 = vector.load %arg3[%c0_3, %c0_4, %c0_5, %c0_6] : memref<1x1x32x16xf32, #tpu.memory_space<vmem>>, vector<1x1x32x16xf32>
      %13 = vector.shape_cast %12 : vector<1x1x32x16xf32> to vector<32x16xf32>
      %14 = vector.broadcast %1 : f32 to vector<32x16xf32>
      %15 = arith.mulf %13, %14 : vector<32x16xf32>
      %16 = vector.broadcast %3 : f32 to vector<32x16xf32>
      %17 = arith.addf %15, %16 : vector<32x16xf32>
      %18 = tpu.iota {dimensions = array<i32: 0>} : vector<32x16xi32>
      %19 = vector.broadcast %4 : i32 to vector<32x16xi32>
      %20 = arith.addi %18, %19 : vector<32x16xi32>
      %c16_i32_7 = arith.constant 16 : i32
      %21 = vector.broadcast %c16_i32_7 : i32 to vector<32x16xi32>
      %22 = arith.cmpi slt, %20, %21 : vector<32x16xi32>
      %cst_8 = arith.constant 0.000000e+00 : f32
      %23 = vector.broadcast %cst_8 : f32 to vector<32x16xf32>
      %24 = arith.select %22, %17, %23 : vector<32x16xi1>, vector<32x16xf32>
      %c0_9 = arith.constant 0 : index
      %c0_10 = arith.constant 0 : index
      %c0_11 = arith.constant 0 : index
      %c0_12 = arith.constant 0 : index
      %25 = vector.load %arg6[%c0_9, %c0_10, %c0_11, %c0_12] : memref<1x1x32x32xf32, #tpu.memory_space<vmem>>, vector<1x1x32x16xf32>
      %26 = vector.shape_cast %25 : vector<1x1x32x16xf32> to vector<32x16xf32>
      %27 = vector.shape_cast %24 : vector<32x16xf32> to vector<1x1x32x16xf32>
      tpu.vector_store %arg6[%c0_9, %c0_10, %c0_11, %c0_12], %27 {strides = array<i32>} : memref<1x1x32x32xf32, #tpu.memory_space<vmem>>, vector<1x1x32x16xf32>,
    } else {
    }
    return
  }
  func.func @transform_0(%arg0: i32, %arg1: i32, %arg2: i32) -> (i32, i32, i32, i32) {
    %c0_i32 = arith.constant 0 : i32
    %0 = arith.minsi %arg2, %c0_i32 : i32
    %c0_i32_0 = arith.constant 0 : i32
    %c0_i32_1 = arith.constant 0 : i32
    return %arg0, %arg1, %0, %c0_i32_0 : i32, i32, i32, i32
  }
  func.func @transform_1(%arg0: i32, %arg1: i32, %arg2: i32) -> i32 {
    %c0_i32 = arith.constant 0 : i32
    %c0_i32_0 = arith.constant 0 : i32
    return %c0_i32 : i32
  }
  func.func @transform_2(%arg0: i32, %arg1: i32, %arg2: i32) -> i32 {
    %c0_i32 = arith.constant 0 : i32
    %c0_i32_0 = arith.constant 0 : i32
    return %c0_i32 : i32
  }
  func.func @transform_3(%arg0: i32, %arg1: i32, %arg2: i32) -> (i32, i32, i32, i32) {
    %c0_i32 = arith.constant 0 : i32
    %c0_i32_0 = arith.constant 0 : i32
    return %arg0, %arg1, %arg2, %c0_i32 : i32, i32, i32, i32
  }
}

</mosaic_0001>

<bundles_post_ra>
// kernel: tpu_custom_call.1
= control target key start
LH: loop header
LB: loop body
LE: loop exit
PB: predicated region body
PF: predicated region fallthrough
CT: control target
= control target key end

     0   :  { %s942_s0 = inlined_call_operand.hbm [shape: f32[2,3,16,16], index: 0, kind: input, shape index: {}]   ;;  %s943_s1 = inlined_call_operand.hbm [shape: f32[3], index: 1, kind: input, shape index: {}]   ;;  %s944_s2 = inlined_call_operand.vmem [shape: f32[3], index: 2, kind: input, shape index: {}]   ;;  %s945_s3 = inlined_call_operand.hbm [shape: f32[2,3,32,32], index: 3, kind: output, shape index: {}]  }
   0x1   :  { %948 = sst [smem:[#allocation16_spill]] %s943_s1 }
   0x2   :  { %949 = sst [smem:[#allocation17_spill]] %s944_s2 }
   0x3   :  { %8 = vsyncpa [#allocation3], 0 }
   0x4   :  { %10 = vsyncpa [#allocation3 + $0x1], 0 }
   0x5   :  { %11 = vsyncpa [#allocation5], 0 }
   0x6   :  { %12 = vsyncpa [#allocation6], 0 }
   0x7   :  { %13 = vsyncpa [#allocation4], 0 }
   0x8   :  { %15 = vsyncpa [#allocation4 + $0x1], 0  ;;  %s764_s12 = smov 0   ;;  %s766_s13 = smov 0  }
   0x9   :  { %s768_s14 = smov 0   ;;  %s770_s15 = smov 0  }
   0xa   :  { %s772_s16 = smov 0   ;;  %s774_s17 = smov 0  }
   0xb   :  { %s776_s18 = smov 0   ;;  %s778_s19 = smov 0  }
   0xc LB: > { %s456_s20 = sadd.s32 4294967295, %s735_s19   ;;  %s457_s21 = sadd.s32 4294967294, %s735_s19   ;;  %s735_s19 = sphi %s778_s19, %s21_s19   ;;  %s731_s18 = sphi %s776_s18, %s968_s18   ;;  %s727_s17 = sphi %s774_s17, %s967_s17   ;;  %s723_s16 = sphi %s772_s16, %s966_s16   ;;  %s719_s15 = sphi %s770_s15, %s965_s15   ;;  %s715_s14 = sphi %s768_s14, %s964_s14   ;;  %s711_s13 = sphi %s766_s13, %s963_s13   ;;  %s707_s12 = sphi %s764_s12, %s962_s12  }
   0xd   : > { %s36_s22 = sadd.s32 1, %s727_s17  ;;  %s40_s23 = sadd.s32 1, %s731_s18 }
   0xe   : > { %p38_p0 = scmp.ge.s32.totalorder %s36_s22, 3  ;;  %s55_s24 = sadd.s32 1, %s715_s14 }
   0xf   : > { %p62_p1 = scmp.ne.s32.totalorder %s715_s14, %s711_s13  ;;  %p63_p2 = scmp.eq.s32.totalorder %s735_s19, 0 }
  0x10   : > { %s970_s22 = smov (%p38_p0, %s36_s22), 0  ;;  %s972_s23 = smov (!%p38_p0, %s40_s23), %s731_s18 }
  0x11   : > { %950 = sst [smem:[#allocation14_spill]] %s970_s22  ;;  %s49_s25 = ssub.s32 %s727_s17, %s970_s22 }
  0x12   : > { %p817_p3 = por %p63_p2, %p62_p1  ;;  %p42_p4 = scmp.ge.s32.totalorder %s972_s23, 2 }
  0x13   : > { %p68_p5 = scmp.ne.s32.totalorder %s711_s13, %s707_s12  ;;  %p823_p6 = scmp.eq.s32.totalorder %s456_s20, 0 }
  0x14   : > { %p138_p7 = scmp.eq.s32.totalorder %s456_s20, 5  ;;  %s974_s23 = smov (%p42_p4, %s972_s23), 0 }
  0x15   : > { %953 = sst [smem:[#allocation15_spill]] %s974_s23  ;;  %p831_p8 = por %p823_p6, %p68_p5 }
  0x16   : > { %p835_p9 = por %p138_p7, %p62_p1  ;;  %s48_s30 = ssub.s32 %s731_s18, %s974_s23 }
  0x17   : > { %p144_p10 = scmp.eq.s32.totalorder %s457_s21, 5  ;;  %s50_s4 = sor.u32 %s49_s25, %s48_s30 }
  0x18   : > { %p458_p11 = scmp.ge.s32.totalorder %s735_s19, 1  ;;  %p53_p12 = scmp.eq.s32.totalorder %s50_s4, 0 }
  0x19   : > { %p842_p13 = por %p144_p10, %p68_p5  ;;  %p151_p0 = scmp.lt.s32.totalorder %s735_s19, 7 }
  0x1a   : > { %s848_s6 = scalar_select %p53_p12, %s715_s14, %s55_s24  }
  0x1b   : > { %p850_p2 = pnand %p458_p11, %p151_p0  ;;  %s958_s1 = sld [smem:[#allocation16_spill]] }
  0x1c   : > { %s959_s2 = sld [smem:[#allocation17_spill]]  ;;  %s737_s24 = smov [#allocation7]  }
  0x1d   : > { %p488_p1 = pneg %p850_p2  ;;  %s738_s25 = smov [#allocation8]  }
  0x1e   : > { %p461_p5 = scmp.ge.s32.totalorder %s735_s19, 6 }
  0x1f   : > { %p489_p4 = pnand %p488_p1, %p823_p6 }
  0x20   : > { %180 = sbr.rel (%p461_p5) target bundleno = 49 (0x31), region = 24 }
  0x21   : > { %s163_s10 = sshll.u32 %s958_s1, 4  ;;  %s164_s10 = int_to_ptr.hbm [resolvable:$true] %s163_s10 }
  0x22   : > { %s173_s21 = sshll.u32 %s959_s2, 4  ;;  %s174_s21 = int_to_ptr.vmem [resolvable:$true] %s173_s21 }
  0x23   : > { %491 = dma.hbm_to_smem (!%p489_p4), %s164_s10, 16, %s737_s24, [#allocation5]  }
  0x24   : > { %494 = dma.vmem_to_smem (!%p489_p4), %s174_s21, 16, %s738_s25, [#allocation6]  }
  0x25   : > { %183 = sbr.rel (!%p817_p3) target bundleno = 49 (0x31), region = 28  ;;  %s184_s30 = sand.u32 (%p817_p3), 1, %s715_s14  }
  0x26   : > { %s462_s4 = sshll.u32 (%p817_p3), %s184_s30, 5  ;;  %s185_s8 = scalar_lea.sflag (%p817_p3), [#allocation3], %s184_s30 }
  0x27   : > { %s188_s9 = scalar_lea.vmem (%p817_p3), [#allocation2], %s462_s4 }
  0x2a   : > { %196 = vsyncadd %s185_s8, 256  ;;  %s463_s11 = sshll.u32 %s727_s17, 1  ;;  %s475_s20 = smul.u32 6, %s731_s18 }
  0x2b   : > { %s207_s1 = sshll.u32 %s188_s9, 4  ;;  %s739_s23 = smov 128   ;;  %s208_s1 = int_to_ptr.vmem [resolvable:$true] %s207_s1 }
  0x2c   : > { %s201_s10 = sadd.s32 %s475_s20, %s463_s11  ;;  %s740_s22 = smov 8  }
  0x2d   : > { %s464_s24 = sshll.u32 %s201_s10, 3 }
  0x2e   : > { %s203_s2 = scalar_lea.hbm %s942_s0, %s464_s24 }
  0x2f   : > { %s205_s26 = sshll.u32 %s203_s2, 4  ;;  %s206_s26 = int_to_ptr.hbm [resolvable:$true] %s205_s26 }
  0x30   : > { %213 = dma.hbm_to_vmem [thread:$0]  %s206_s26, 256, %s208_s1, %s185_s8, %s739_s23, %s739_s23, %s740_s22  }
  0x31 PF: > { %219 = sbr.rel (%p850_p2) target bundleno = 82 (0x52), region = 32  ;;  %s876_s30 = sand.u32 (!%p850_p2), 1, %s711_s13  }
  0x32   : > { %s466_s4 = sshll.u32 (!%p850_p2), %s876_s30, 5  ;;  %s222_s9 = scalar_lea.sflag (!%p850_p2), [#allocation3], %s876_s30 }
  0x33   : > { %s225_s11 = scalar_lea.vmem (!%p850_p2), [#allocation2], %s466_s4 }
  0x36   : > { %690 = dma.done.wait (%p831_p8), %s222_s9, 512  }
  0x37   : > { %692 = vsyncadd (%p831_p8), %s222_s9, 4294966784 }
  0x38   : > { %694 = dma.done.wait (%p823_p6), [#allocation5], 16  }
  0x39   : > { %696 = vsyncadd (%p823_p6), [#allocation5], 4294967280 }
  0x3a   : > { %698 = dma.done.wait (%p823_p6), [#allocation6], 16  }
  0x3b   : > { %700 = vsyncadd (%p823_p6), [#allocation6], 4294967280 }
  0x3c   : > { %241 = sfence }
  0x3d   : > { %vm269_vm0 = vcmask 261120   ;;  %s266_s1 = sld [smem:[#allocation7 + %s719_s15]]  ;;  %s259_s2 = scalar_lea.vmem [#allocation9], %s466_s4  ;;  %v741_v0 = vmov 0.0   ;;  %vm310_vm1 = vcmask 130048   ;;  %v278_v1 = vld [vmem:[%s225_s11] sm:$0xff] }
  0x3e   : > { %270 = vst.msk [vmem:[%s259_s2] sm:$0xff] %vm269_vm0, %v741_v0  ;;  %s267_s22 = sld [smem:[#allocation8 + %s719_s15]]  ;;  %s471_s23 = sshll.u32 %s719_s15, 2  ;;  %v279_v2 = vld [vmem:[%s225_s11 + $0x8] sm:$0xff] }
  0x3f   : > { %271 = vst.msk [vmem:[%s259_s2 + $0x8] sm:$0xff] %vm269_vm0, %v741_v0  ;;  %s476_s28 = smul.u32 12, %s723_s16  ;;  %s332_s24 = sshll.u32 %s259_s2, 4  ;;  %s333_s24 = int_to_ptr.vmem [resolvable:$true] %s332_s24 }
  0x40   : > { %272 = vst.msk [vmem:[%s259_s2 + $0x10] sm:$0xff] %vm269_vm0, %v741_v0  ;;  %s316_s16 = scalar_lea.sflag [#allocation4], %s876_s30  ;;  %s649_s9 = scalar_lea.hbm %s945_s3, 192 }
  0x41   : > { %273 = vst.msk [vmem:[%s259_s2 + $0x18] sm:$0xff] %vm269_vm0, %v741_v0  ;;  %s329_s27 = sadd.s32 %s476_s28, %s471_s23 }
  0x42   : > { %313 = vst.msk [vmem:[%s259_s2 + $0x10] sm:$0xff] %vm310_vm1, %v741_v0  ;;  %s472_s7 = sshll.u32 %s329_s27, 3 }
  0x43   : > { %v282_v3 = vstv %s266_s1  ;;  %314 = vst.msk [vmem:[%s259_s2 + $0x18] sm:$0xff] %vm310_vm1, %v741_v0  ;;  %s331_s10 = scalar_lea.hbm %s945_s3, %s472_s7 }
  0x44   : > { %v283_v4 = vmul.f32 %v282_v3, %v278_v1  ;;  %v287_v5 = vstv %s267_s22  ;;  %v284_v6 = vmul.f32 %v282_v3, %v279_v2  ;;  %s334_s15 = sshll.u32 %s331_s10, 4  ;;  %s335_s15 = int_to_ptr.hbm [resolvable:$true] %s334_s15 }
  0x45   : > { %s643_s21 = sshra.s32 %s335_s15, 4  ;;  %s644_s21 = int_to_ptr.hbm [resolvable:$true] %s643_s21 }
  0x46   : > { %v288_v7 = vadd.f32 %v287_v5, %v283_v4  ;;  %v289_v8 = vadd.f32 %v287_v5, %v284_v6  ;;  %s645_s25 = scalar_lea.hbm %s644_s21, 32  ;;  %p650_p8 = scmp.lt.s32.totalorder %s644_s21, %s945_s3 }
  0x47   : > { %p646_p3 = scmp.ne.s32.totalorder %s644_s21, %s645_s25  ;;  %p651_p10 = scmp.lt.s32.totalorder %s649_s9, %s645_s25 }
  0x48   : > { %311 = vst.msk [vmem:[%s259_s2] sm:$0xff] %vm310_vm1, %v288_v7 }
  0x49   : > { %312 = vst.msk [vmem:[%s259_s2 + $0x8] sm:$0xff] %vm310_vm1, %v289_v8  ;;  %p647_p6 = pnand %p646_p3, %p835_p9  ;;  %p652_p11 = por %p651_p10, %p650_p8 }
  0x4b   : > { %p648_p7 = pneg %p647_p6 }
  0x4d   : > { %p653_p12 = pnand %p652_p11, %p648_p7 }
  0x4f   : > { %656 = shalt.err (!%p653_p12)
}
  0x50   : > { %s742_s30 = smov 128   ;;  %s743_s2 = smov 8  }
  0x51   : > { %486 = dma.vmem_to_hbm [thread:$0]  (%p835_p9), %s333_s24, 512, %s335_s15, %s316_s16, %s742_s30, %s742_s30, %s743_s2  }
  0x52 PF: > { %p503_p0 = scmp.ge.s32.totalorder %s735_s19, 2  ;;  %s349_s22 = sand.u32 1, %s707_s12  }
  0x53   : > { %s350_s23 = scalar_lea.sflag [#allocation4], %s349_s22 }
  0x54   : > { %p496_p2 = pnand %p503_p0, %p842_p13 }
  0x56   : > { %p497_p1 = pneg %p496_p2 }
  0x58   : > { %702 = dma.done.wait (%p497_p1), %s350_s23, 512  }
  0x59   : > { %704 = vsyncadd (%p497_p1), %s350_s23, 4294966784  ;;  %s21_s19 = sadd.s32 1, %s735_s19   ;;  %s960_s29 = sld [smem:[#allocation14_spill]] }
  0x5a   : > { %p18_p4 = scmp.ge.s32.totalorder %s21_s19, 8   ;;  %s961_s28 = sld [smem:[#allocation15_spill]] }
  0x5b   : > { %s962_s12 = smov %s711_s13  ;;  %s963_s13 = smov %s715_s14 }
  0x5c   : > { %s964_s14 = smov %s848_s6  ;;  %s965_s15 = smov %s727_s17 }
  0x5d   : > { %s966_s16 = smov %s731_s18  ;;  %20 = sbr.rel (!%p18_p4) target bundleno = 12 (0xc), region = 91 }
  0x5f   : > { %s967_s17 = smov %s960_s29 }
  0x60   : > { %s968_s18 = smov %s961_s28 }
  0x62   :  { %356 = vsyncpa [#allocation3], 1 }
  0x63   :  { %358 = vsyncpa [#allocation3 + $0x1], 1 }
  0x64   :  { %359 = vsyncpa [#allocation4], 1 }
  0x65   :  { %361 = vsyncpa [#allocation4 + $0x1], 1 }
  0x66   :  { %362 = vsyncpa [#allocation5], 1 }
  0x67   :  { %364 = vsyncpa [#allocation5 + $0x1], 1 }
  0x68   :  { %365 = vsyncpa [#allocation6], 1 }
  0x69   :  { %367 = vsyncpa [#allocation6 + $0x1], 1 }

</bundles_post_ra>
